<compile_context>
chip_gen: v7x
topology: tpu7x:2x2x1
jax: 0.10.0
libtpu: 0.0.40
codegen_flags: <defaults>
</compile_context>

<pallas_src>
import jax
import jax.numpy as jnp
from jax.experimental import pallas as pl
from jax.experimental.pallas import tpu as pltpu

_LANE = 128
_DEFAULT_BLOCK_BYTES = 4 << 20  # ~4 MiB per buffer


def _center_kernel(x_ref, m_ref, o_ref):
    # x_ref/o_ref: (row_block, col_block); m_ref: (row_block, 1) or (1, col_block).
    o_ref[...] = x_ref[...] - m_ref[...]


def _sublane_multiple(itemsize: int) -> int:
    # 32-bit: 8 rows per vreg; 16-bit packs 2 rows per sublane; 8-bit packs 4.
    if itemsize >= 4:
        return 8
    if itemsize == 2:
        return 16
    return 32


def _vmem_capacity_bytes():
    try:
        return int(pltpu.get_tpu_info().vmem_capacity_bytes)
    except Exception:
        return None


def _block_byte_budget() -> int:
    """Per-buffer block byte target, generation-aware.

    Double-buffered (in + out) blocks plus the mean operand must stay well
    inside physical VMEM (64 MiB/TC on v7x, 128 MiB on v5e/v6e), so target
    ~vmem/16 per buffer, capped at 4 MiB (past that the ~0.35us fixed
    per-grid-step cost is already well amortized).
    """
    vmem = _vmem_capacity_bytes()
    if vmem is None:
        return _DEFAULT_BLOCK_BYTES
    return max(512 << 10, min(_DEFAULT_BLOCK_BYTES, vmem // 16))


def _pick_blocks(rows: int, cols: int, itemsize: int, budget: int, sub: int):
    """Choose a lane/sublane-aligned (row_block, col_block) near `budget` bytes."""
    # Column (lane) block: full extent when it fits, otherwise a large multiple
    # of 128 near the target.  pl.cdiv + Pallas edge masking handle a ragged
    # last block, so cols need NOT be 128-divisible.
    if cols * itemsize > budget:
        col_block = max(_LANE, (budget // itemsize // _LANE) * _LANE)
        col_block = min(col_block, cols)
    else:
        col_block = cols

    # Row (sublane) block: fill the remaining budget, rounded to the dtype's
    # packed-sublane multiple, or the full extent when the array is small.
    rows_per_block = max(1, budget // (col_block * itemsize))
    if rows_per_block >= rows:
        row_block = rows
    else:
        row_block = max(sub, (rows_per_block // sub) * sub)
        row_block = min(row_block, rows)
    return row_block, col_block


def input_center_layer(x: jax.Array, means: jax.Array) -> jax.Array:
    """x: (B, C, H, W); means: (C,). Returns x - means[None, :, None, None]."""
    B, C, H, W = x.shape
    dtype = x.dtype
    itemsize = jnp.dtype(dtype).itemsize
    sub = _sublane_multiple(itemsize)
    budget = _block_byte_budget()

    # Lane-dense 2D view + matching broadcastable mean operand.
    if H * W >= _LANE:
        rows, cols = B * C, H * W
        x2 = x.reshape(rows, cols)
        # row r = b*C + c  ->  channel mean means[r % C]
        means_op = jnp.tile(means.astype(dtype), B).reshape(rows, 1)
        two_d_mean = True
    else:
        # Small feature maps: keep the last dim lane-dense as (B, C*H*W) with
        # a (1, C*H*W) mean row broadcast across the sublane axis.
        rows, cols = B, C * H * W
        x2 = x.reshape(rows, cols)
        means_op = jnp.repeat(means.astype(dtype), H * W).reshape(1, cols)
        two_d_mean = False

    row_block, col_block = _pick_blocks(rows, cols, itemsize, budget, sub)

    # v7x has 2 TensorCores: make sure a non-trivial array exposes >= 2
    # parallel grid steps so both cores get work (harmless on v5e/v6e).
    if (pl.cdiv(rows, row_block) == 1 and pl.cdiv(cols, col_block) == 1
            and rows >= 2 * sub):
        half = (row_block + 1) // 2
        row_block = ((half + sub - 1) // sub) * sub

    grid = (pl.cdiv(rows, row_block), pl.cdiv(cols, col_block))

    if two_d_mean:
        mean_spec = pl.BlockSpec((row_block, 1), lambda i, j: (i, 0))
    else:
        mean_spec = pl.BlockSpec((1, col_block), lambda i, j: (0, j))

    # 2x double-buffered (in + out) blocks + mean operand + compiler slack.
    block_bytes = row_block * col_block * itemsize
    vmem_limit = int(max(4 * block_bytes + (8 << 20), 16 << 20))

    cost = pl.CostEstimate(
        flops=rows * cols,
        transcendentals=0,
        bytes_accessed=2 * rows * cols * itemsize + int(means_op.size) * itemsize,
    )

    out2 = pl.pallas_call(
        _center_kernel,
        out_shape=jax.ShapeDtypeStruct((rows, cols), dtype),
        grid=grid,
        in_specs=[
            pl.BlockSpec((row_block, col_block), lambda i, j: (i, j)),
            mean_spec,
        ],
        out_specs=pl.BlockSpec((row_block, col_block), lambda i, j: (i, j)),
        compiler_params=pltpu.CompilerParams(
            dimension_semantics=("parallel", "parallel"),
            vmem_limit_bytes=vmem_limit,
        ),
        cost_estimate=cost,
    )(x2, means_op)

    return out2.reshape(B, C, H, W)


if __name__ == "__main__":
    key = jax.random.PRNGKey(0)
    B, C, H, W = 2, 4, 16, 16

    # Deterministic "dataset means" for the 4 channels (module's __init__ arg).
    means = jnp.array([0.485, 0.456, 0.406, 0.5], dtype=jnp.float32)

    x = jax.random.normal(key, (B, C, H, W), dtype=jnp.float32)

    out = input_center_layer(x, means)
    out = jax.block_until_ready(out)

    # Reference check (plain JAX, mirrors the PyTorch broadcast semantics).
    ref = x - means[None, :, None, None]
    assert out.shape == (B, C, H, W)
    assert out.dtype == x.dtype
    assert jnp.allclose(out, ref, atol=1e-6, rtol=1e-6)

    print("KERNEL_OK")
</pallas_src>

<mosaic_0001>
module attributes {stable_mosaic.version = 11 : i64} {
  func.func @_center_kernel(%arg0: i32, %arg1: i32, %arg2: memref<8x256xf32, #tpu.memory_space<vmem>>, %arg3: memref<8x1xf32, #tpu.memory_space<vmem>>, %arg4: memref<8x256xf32, #tpu.memory_space<vmem>>) attributes {dimension_semantics = [#tpu.dimension_semantics<parallel>, #tpu.dimension_semantics<parallel>], iteration_bounds = array<i64: 1, 1>, scalar_prefetch = 0 : i64, scratch_operands = 0 : i64, tpu.core_type = #tpu.core_type<tc>, window_params = [{transform_indices = @transform_0, window_bounds = array<i64: 8, 256>}, {transform_indices = @transform_1, window_bounds = array<i64: 8, 1>}, {transform_indices = @transform_2, window_bounds = array<i64: 8, 256>}]} {
    %c0 = arith.constant 0 : index
    %c0_0 = arith.constant 0 : index
    %0 = vector.load %arg2[%c0, %c0_0] : memref<8x256xf32, #tpu.memory_space<vmem>>, vector<8x256xf32>
    %c0_1 = arith.constant 0 : index
    %c0_2 = arith.constant 0 : index
    %1 = vector.load %arg3[%c0_1, %c0_2] : memref<8x1xf32, #tpu.memory_space<vmem>>, vector<8x1xf32>
    %2 = vector.broadcast %1 : vector<8x1xf32> to vector<8x256xf32>
    %3 = arith.subf %0, %2 : vector<8x256xf32>
    %c0_3 = arith.constant 0 : index
    %c0_4 = arith.constant 0 : index
    %4 = vector.load %arg4[%c0_3, %c0_4] : memref<8x256xf32, #tpu.memory_space<vmem>>, vector<8x256xf32>
    tpu.vector_store %arg4[%c0_3, %c0_4], %3 {strides = array<i32>} : memref<8x256xf32, #tpu.memory_space<vmem>>, vector<8x256xf32>,
    return
  }
  func.func @transform_0(%arg0: i32, %arg1: i32) -> (i32, i32) {
    %c0_i32 = arith.constant 0 : i32
    return %arg0, %arg1 : i32, i32
  }
  func.func @transform_1(%arg0: i32, %arg1: i32) -> (i32, i32) {
    %c0_i32 = arith.constant 0 : i32
    %c0_i32_0 = arith.constant 0 : i32
    return %arg0, %c0_i32 : i32, i32
  }
  func.func @transform_2(%arg0: i32, %arg1: i32) -> (i32, i32) {
    %c0_i32 = arith.constant 0 : i32
    return %arg0, %arg1 : i32, i32
  }
}

</mosaic_0001>

<bundles_post_ra>
// kernel: tpu_custom_call.1
= control target key start
LH: loop header
LB: loop body
LE: loop exit
PB: predicated region body
PF: predicated region fallthrough
CT: control target
= control target key end

     0   :  { %7 = vsyncpa [#allocation3], 0  ;;  %s148_s0 = inlined_call_operand.hbm [shape: f32[8,256], index: 0, kind: input, shape index: {}]   ;;  %s149_s1 = inlined_call_operand.vmem [shape: f32[8,1], index: 1, kind: input, shape index: {}]   ;;  %s150_s2 = inlined_call_operand.hbm [shape: f32[8,256], index: 2, kind: output, shape index: {}]  }
   0x1   :  { %8 = vsyncpa [#allocation4], 0  ;;  %s103_s9 = smov [#allocation2]   ;;  %s55_s13 = scalar_lea.hbm %s148_s0, 256 }
   0x2   :  { %s15_s10 = sshll.u32 %s103_s9, 4  ;;  %p56_p0 = scmp.ne.s32.totalorder %s148_s0, %s55_s13  ;;  %s16_s10 = int_to_ptr.vmem [resolvable:$true] %s15_s10 }
   0x3   :  { %p59_p1 = scmp.lt.u32.totalorder %s55_s13, %s148_s0 }
   0x5   :  { %p61_p2 = pnand %p59_p1, %p56_p0 }
   0x7   :  { %64 = shalt.err (!%p61_p2)
}
   0x8   :  { %s65_s18 = scalar_lea.vmem %s16_s10, 256  ;;  %p70_p4 = scmp.lt.s32.totalorder %s16_s10, %s16_s10 }
   0x9   :  { %p66_p3 = scmp.ne.s32.totalorder %s16_s10, %s65_s18  ;;  %p71_p5 = scmp.lt.s32.totalorder %s65_s18, %s65_s18 }
   0xb   :  { %p72_p6 = por %p71_p5, %p70_p4 }
   0xd   :  { %p73_p7 = pnand %p72_p6, %p66_p3 }
   0xf   :  { %76 = shalt.err (!%p73_p7)
}
  0x10   :  { %18 = dma.hbm_to_vmem [thread:$0]  %s148_s0, 256, %s16_s10, [#allocation3]  }
  0x11   :  { %99 = dma.done.wait [#allocation3], 256  }
  0x12   :  { %100 = vsyncadd [#allocation3], 4294967040  ;;  %v104_v0 = vmov 0   ;;  %v26_v1 = vld [vmem:[%s149_s1] sm:$0xff]  ;;  %v25_v3 = vld [vmem:[#allocation2 + $0x8] sm:$0xff]  ;;  %s105_s23 = smov [#allocation5]  }
  0x13   :  { %54 = vset.pattern.permute.xlu0 %v104_v0  ;;  %v24_v2 = vld [vmem:[#allocation2] sm:$0xff]  ;;  %s42_s24 = sshll.u32 %s105_s23, 4  ;;  %s43_s24 = int_to_ptr.vmem [resolvable:$true] %s42_s24 }
  0x14   :  { %29 = vperm.xlu0 %54, %v26_v1   ;;  %s77_s0 = scalar_lea.vmem %s43_s24, 256  ;;  %p82_p9 = scmp.lt.s32.totalorder %s43_s24, %s43_s24 }
  0x15   :  { %p78_p8 = scmp.ne.s32.totalorder %s43_s24, %s77_s0  ;;  %p83_p10 = scmp.lt.s32.totalorder %s77_s0, %s77_s0 }
  0x17   :  { %p84_p11 = por %p83_p10, %p82_p9 }
  0x19   :  { %p85_p12 = pnand %p84_p11, %p78_p8 }
  0x93   :  { %v30_v4 = vpop.permute.xlu0 %29 }
  0x94   :  { %v32_v5 = vsub.f32 %v24_v2, %v30_v4  ;;  %v33_v6 = vsub.f32 %v25_v3, %v30_v4 }
  0x96   :  { %34 = vst [vmem:[#allocation5] sm:$0xff] %v32_v5  ;;  %35 = vst [vmem:[#allocation5 + $0x8] sm:$0xff] %v33_v6 }
  0x97   :  { %88 = shalt.err (!%p85_p12)
}
  0x98   :  { %s89_s26 = scalar_lea.hbm %s150_s2, 256 }
  0x99   :  { %p90_p13 = scmp.ne.s32.totalorder %s150_s2, %s89_s26  ;;  %p93_p0 = scmp.lt.u32.totalorder %s89_s26, %s150_s2 }
  0x9b   :  { %p95_p1 = pnand %p93_p0, %p90_p13 }
  0x9d   :  { %98 = shalt.err (!%p95_p1)
}
  0x9e   :  { %45 = dma.vmem_to_hbm [thread:$0]  %s43_s24, 256, %s150_s2, [#allocation4]  }
  0x9f   :  { %101 = dma.done.wait [#allocation4], 256  }
  0xa0   :  { %102 = vsyncadd [#allocation4], 4294967040 }
  0xa1   :  { %49 = vsyncpa [#allocation3], 1 }
  0xa2   :  { %50 = vsyncpa [#allocation4], 1 }

</bundles_post_ra>
